<compile_context>
chip_gen: v7x
topology: tpu7x:2x2x1
jax: 0.10.0
libtpu: 0.0.40
codegen_flags: <defaults>
</compile_context>

<pallas_src>
import functools

import jax
import jax.numpy as jnp
from jax.experimental import pallas as pl
from jax.experimental.pallas import tpu as pltpu


def _mlp_kernel(x1_ref, x2_ref, w1a_ref, w1b_ref, b1_ref, w2_ref, b2_ref,
                w3_ref, b3_ref, o_ref):
    # Layer 1: two K=D matmuls (same MXU cycles as one K=2D matmul, no concat).
    h = jnp.dot(x1_ref[...], w1a_ref[...], preferred_element_type=jnp.float32)
    h = h + jnp.dot(x2_ref[...], w1b_ref[...], preferred_element_type=jnp.float32)
    h = jnp.maximum(h + b1_ref[...], 0.0)        # ReLU (Dropout = identity at eval)

    # Layer 2: (block_b, H) @ (H, H) on the MXU, f32 accumulation.
    h = h.astype(w2_ref.dtype)                   # bf16 feed when enabled, else no-op
    h = jnp.dot(h, w2_ref[...], preferred_element_type=jnp.float32)
    h = jnp.maximum(h + b2_ref[...], 0.0)        # ReLU (Dropout = identity at eval)

    # Layer 3 (H -> 1): contract H against an (8, H) broadcast of w3 so the MXU
    # produces an (8, block_b) row block already in the lane-dense layout the
    # output store needs (no cross-lane relayout of a reduced vector).
    out = jax.lax.dot_general(w3_ref[...], h, (((1,), (1,)), ((), ())),
                              preferred_element_type=jnp.float32)
    o_ref[...] = out[0:1, :] + b3_ref[0]         # row 0 + scalar bias (SMEM)


@functools.partial(jax.jit, static_argnames=("block_b", "use_bf16"))
def distance_mlp_forward(x1, x2, params, *, block_b=512, use_bf16=False):
    """Forward pass of DistanceMLP (eval mode). Returns shape (B,)."""
    w1, b1, w2, b2, w3, b3 = params
    B, D = x1.shape
    H = w1.shape[1]
    assert x2.shape == (B, D)
    assert w1.shape == (2 * D, H)

    # --- Batch tiling --------------------------------------------------------
    # Lane-dense output wants block_b % 128 == 0 (or a single full-batch tile);
    # keep >= 2 grid steps when B > 128 so the "parallel" axis can shard across
    # v7x's two TensorCores.
    if B <= 128:
        block_b = B                                        # one full-batch tile
    else:
        block_b = max(128, (block_b // 128) * 128)
        block_b = min(block_b, 128 * ((B + 255) // 256))   # ~ceil(B/2), 128-aligned
    n_tiles = pl.cdiv(B, block_b)
    rows = n_tiles * block_b                               # rows actually computed

    # --- Operand dtypes ------------------------------------------------------
    # bf16 matmul operands (f32 accumulation) reach MXU peak on v5e/v6e/v7x and
    # halve weight VMEM/HBM bytes; bias add / ReLU / layer-3 epilogue stay f32.
    mm_dtype = jnp.bfloat16 if use_bf16 else jnp.float32
    x1_mm = x1.astype(mm_dtype)
    x2_mm = x2.astype(mm_dtype)
    w1a_mm = w1[:D].astype(mm_dtype)                       # (D, H)
    w1b_mm = w1[D:].astype(mm_dtype)                       # (D, H)
    w2_mm = w2.astype(mm_dtype)                            # (H, H)
    b1_row = b1.reshape(1, H).astype(jnp.float32)
    b2_row = b2.reshape(1, H).astype(jnp.float32)
    w3_b = jnp.broadcast_to(w3.reshape(1, H).astype(jnp.float32), (8, H))
    b3_s = b3.reshape(1).astype(jnp.float32)               # SMEM scalar

    # --- Explicit VMEM budget ------------------------------------------------
    itm = jnp.dtype(mm_dtype).itemsize
    weight_vmem = ((w1a_mm.size + w1b_mm.size + w2_mm.size) * itm
                   + (b1_row.size + b2_row.size + w3_b.size) * 4)
    vmem_needed = (2 * weight_vmem                 # resident weights (dbl-buffered)
                   + 2 * 2 * block_b * D * itm     # x1/x2 streamed tiles
                   + 2 * block_b * 4               # out tile
                   + 3 * block_b * H * 4)          # live activations
    vmem_limit = int(min(128 << 20,
                         max(int(vmem_needed * 1.25) + (2 << 20), 16 << 20)))

    cost = pl.CostEstimate(
        flops=2 * rows * (2 * D * H + H * H + 8 * H),
        transcendentals=0,
        bytes_accessed=(2 * B * D * itm            # x1 + x2 read straight from HBM
                        + weight_vmem              # weights read once
                        + rows * 4),               # output
    )

    # Weights/biases replicated to every grid step -> DMA'd once, VMEM-resident.
    rep = lambda shape: pl.BlockSpec(shape, lambda i: (0, 0))

    out = pl.pallas_call(
        _mlp_kernel,
        out_shape=jax.ShapeDtypeStruct((1, rows), jnp.float32),
        grid_spec=pltpu.PrefetchScalarGridSpec(
            num_scalar_prefetch=0,
            grid=(n_tiles,),
            in_specs=[
                pl.BlockSpec((block_b, D), lambda i: (i, 0)),        # x1 tile
                pl.BlockSpec((block_b, D), lambda i: (i, 0)),        # x2 tile
                rep((D, H)),                                         # w1a
                rep((D, H)),                                         # w1b
                rep((1, H)),                                         # b1
                rep((H, H)),                                         # w2
                rep((1, H)),                                         # b2
                rep((8, H)),                                         # w3 (bcast rows)
                pl.BlockSpec(memory_space=pltpu.MemorySpace.SMEM),   # b3 scalar
            ],
            # Lane-dense, fully-covered output: one (1, block_b) row per tile.
            out_specs=pl.BlockSpec((1, block_b), lambda i: (0, i)),
        ),
        compiler_params=pltpu.CompilerParams(
            dimension_semantics=("parallel",),      # megacore-shardable batch axis
            vmem_limit_bytes=vmem_limit),
        cost_estimate=cost,
    )(x1_mm, x2_mm, w1a_mm, w1b_mm, b1_row, w2_mm, b2_row, w3_b, b3_s)

    return out[0, :B]                               # drop computed tail; squeeze(-1)


def init_params(key, input_dim, hidden_dim):
    """Deterministic init mimicking PyTorch nn.Linear defaults
    (uniform +/- 1/sqrt(fan_in)); weights stored as (in, out)."""
    k = jax.random.split(key, 6)

    def lin(kw, kb, fan_in, fan_out):
        bound = 1.0 / jnp.sqrt(jnp.float32(fan_in))
        w = jax.random.uniform(kw, (fan_in, fan_out), jnp.float32, -bound, bound)
        b = jax.random.uniform(kb, (1, fan_out), jnp.float32, -bound, bound)
        return w, b

    w1, b1 = lin(k[0], k[1], 2 * input_dim, hidden_dim)
    w2, b2 = lin(k[2], k[3], hidden_dim, hidden_dim)
    w3, b3 = lin(k[4], k[5], hidden_dim, 1)
    return (w1, b1, w2, b2, w3, b3)


def reference_forward(x1, x2, params):
    """Pure-JAX reference of the PyTorch forward (eval mode)."""
    w1, b1, w2, b2, w3, b3 = params
    x = jnp.concatenate([x1, x2], axis=-1)
    h = jnp.maximum(x @ w1 + b1, 0.0)
    h = jnp.maximum(h @ w2 + b2, 0.0)
    return (h @ w3 + b3)[:, 0]


if __name__ == "__main__":
    # Small demo shapes: batch not a multiple of the tile (exercises the ragged
    # tail block), 2 grid steps at block_b=128, hidden_dim = module default.
    B, D, H = 200, 16, 128

    key = jax.random.PRNGKey(0)
    kx1, kx2, kp = jax.random.split(key, 3)
    x1 = jax.random.normal(kx1, (B, D), jnp.float32)
    x2 = jax.random.normal(kx2, (B, D), jnp.float32)
    params = init_params(kp, D, H)

    y_ref = reference_forward(x1, x2, params)

    # f32 path (accuracy check vs. reference).
    y = jax.block_until_ready(
        distance_mlp_forward(x1, x2, params, block_b=128, use_bf16=False))
    assert y.shape == (B,)
    assert jnp.allclose(y, y_ref, atol=1e-4, rtol=1e-4)

    # bf16-operand path (MXU-peak mode on v5e/v6e/v7x); validated at the looser
    # tolerance appropriate for bf16 matmul inputs.
    y16 = jax.block_until_ready(
        distance_mlp_forward(x1, x2, params, block_b=128, use_bf16=True))
    assert y16.shape == (B,)
    assert jnp.allclose(y16, y_ref, atol=1e-1, rtol=1e-1)

    print("KERNEL_OK")
</pallas_src>

<mosaic_0001>
module attributes {stable_mosaic.version = 11 : i64} {
  func.func @_mlp_kernel(%arg0: i32, %arg1: memref<128x16xf32, #tpu.memory_space<vmem>>, %arg2: memref<128x16xf32, #tpu.memory_space<vmem>>, %arg3: memref<16x128xf32, #tpu.memory_space<vmem>>, %arg4: memref<16x128xf32, #tpu.memory_space<vmem>>, %arg5: memref<1x128xf32, #tpu.memory_space<vmem>>, %arg6: memref<128x128xf32, #tpu.memory_space<vmem>>, %arg7: memref<1x128xf32, #tpu.memory_space<vmem>>, %arg8: memref<8x128xf32, #tpu.memory_space<vmem>>, %arg9: memref<1xf32, #tpu.memory_space<smem>>, %arg10: memref<1x128xf32, #tpu.memory_space<vmem>>) attributes {dimension_semantics = [#tpu.dimension_semantics<parallel>], iteration_bounds = array<i64: 2>, scalar_prefetch = 0 : i64, scratch_operands = 0 : i64, tpu.core_type = #tpu.core_type<tc>, window_params = [{transform_indices = @transform_0, window_bounds = array<i64: 128, 16>}, {transform_indices = @transform_1, window_bounds = array<i64: 128, 16>}, {pipeline_mode = #tpu.pipeline_mode<synchronous>, transform_indices = @transform_2, window_bounds = array<i64: 16, 128>}, {pipeline_mode = #tpu.pipeline_mode<synchronous>, transform_indices = @transform_3, window_bounds = array<i64: 16, 128>}, {pipeline_mode = #tpu.pipeline_mode<synchronous>, transform_indices = @transform_4, window_bounds = array<i64: 1, 128>}, {pipeline_mode = #tpu.pipeline_mode<synchronous>, transform_indices = @transform_5, window_bounds = array<i64: 128, 128>}, {pipeline_mode = #tpu.pipeline_mode<synchronous>, transform_indices = @transform_6, window_bounds = array<i64: 1, 128>}, {pipeline_mode = #tpu.pipeline_mode<synchronous>, transform_indices = @transform_7, window_bounds = array<i64: 8, 128>}, {transform_indices = @transform_8, window_bounds = array<i64: 1>}, {transform_indices = @transform_9, window_bounds = array<i64: 1, 128>}]} {
    %c0 = arith.constant 0 : index
    %c0_0 = arith.constant 0 : index
    %0 = vector.load %arg1[%c0, %c0_0] : memref<128x16xf32, #tpu.memory_space<vmem>>, vector<128x16xf32>
    %c0_1 = arith.constant 0 : index
    %c0_2 = arith.constant 0 : index
    %1 = vector.load %arg3[%c0_1, %c0_2] : memref<16x128xf32, #tpu.memory_space<vmem>>, vector<16x128xf32>
    %cst = arith.constant dense<0.000000e+00> : vector<128x128xf32>
    %2 = tpu.matmul %0, %1, %cst {dimension_numbers = #tpu.dot_dimension_numbers<[1], [0], [0], [1], [0, 0, 1, 1], [], []>} : vector<128x16xf32>, vector<16x128xf32>, vector<128x128xf32> -> vector<128x128xf32>
    %c0_3 = arith.constant 0 : index
    %c0_4 = arith.constant 0 : index
    %3 = vector.load %arg2[%c0_3, %c0_4] : memref<128x16xf32, #tpu.memory_space<vmem>>, vector<128x16xf32>
    %c0_5 = arith.constant 0 : index
    %c0_6 = arith.constant 0 : index
    %4 = vector.load %arg4[%c0_5, %c0_6] : memref<16x128xf32, #tpu.memory_space<vmem>>, vector<16x128xf32>
    %cst_7 = arith.constant dense<0.000000e+00> : vector<128x128xf32>
    %5 = tpu.matmul %3, %4, %cst_7 {dimension_numbers = #tpu.dot_dimension_numbers<[1], [0], [0], [1], [0, 0, 1, 1], [], []>} : vector<128x16xf32>, vector<16x128xf32>, vector<128x128xf32> -> vector<128x128xf32>
    %6 = arith.addf %2, %5 : vector<128x128xf32>
    %c0_8 = arith.constant 0 : index
    %c0_9 = arith.constant 0 : index
    %7 = vector.load %arg5[%c0_8, %c0_9] : memref<1x128xf32, #tpu.memory_space<vmem>>, vector<1x128xf32>
    %8 = vector.broadcast %7 : vector<1x128xf32> to vector<128x128xf32>
    %9 = arith.addf %6, %8 : vector<128x128xf32>
    %cst_10 = arith.constant 0.000000e+00 : f32
    %10 = vector.broadcast %cst_10 : f32 to vector<128x128xf32>
    %11 = arith.maximumf %9, %10 : vector<128x128xf32>
    %c0_11 = arith.constant 0 : index
    %c0_12 = arith.constant 0 : index
    %12 = vector.load %arg6[%c0_11, %c0_12] : memref<128x128xf32, #tpu.memory_space<vmem>>, vector<128x128xf32>
    %cst_13 = arith.constant dense<0.000000e+00> : vector<128x128xf32>
    %13 = tpu.matmul %11, %12, %cst_13 {dimension_numbers = #tpu.dot_dimension_numbers<[1], [0], [0], [1], [0, 0, 1, 1], [], []>} : vector<128x128xf32>, vector<128x128xf32>, vector<128x128xf32> -> vector<128x128xf32>
    %c0_14 = arith.constant 0 : index
    %c0_15 = arith.constant 0 : index
    %14 = vector.load %arg7[%c0_14, %c0_15] : memref<1x128xf32, #tpu.memory_space<vmem>>, vector<1x128xf32>
    %15 = vector.broadcast %14 : vector<1x128xf32> to vector<128x128xf32>
    %16 = arith.addf %13, %15 : vector<128x128xf32>
    %cst_16 = arith.constant 0.000000e+00 : f32
    %17 = vector.broadcast %cst_16 : f32 to vector<128x128xf32>
    %18 = arith.maximumf %16, %17 : vector<128x128xf32>
    %c0_17 = arith.constant 0 : index
    %c0_18 = arith.constant 0 : index
    %19 = vector.load %arg8[%c0_17, %c0_18] : memref<8x128xf32, #tpu.memory_space<vmem>>, vector<8x128xf32>
    %cst_19 = arith.constant dense<0.000000e+00> : vector<8x128xf32>
    %20 = tpu.matmul %19, %18, %cst_19 {dimension_numbers = #tpu.dot_dimension_numbers<[1], [1], [0], [0], [0, 0, 1, 0], [], []>} : vector<8x128xf32>, vector<128x128xf32>, vector<8x128xf32> -> vector<8x128xf32>
    %21 = vector.extract_strided_slice %20 {offsets = [0, 0], sizes = [1, 128], strides = [1, 1]} : vector<8x128xf32> to vector<1x128xf32>
    %c0_20 = arith.constant 0 : index
    %22 = memref.load %arg9[%c0_20] : memref<1xf32, #tpu.memory_space<smem>>
    %23 = vector.broadcast %22 : f32 to vector<1x128xf32>
    %24 = arith.addf %21, %23 : vector<1x128xf32>
    %c0_21 = arith.constant 0 : index
    %c0_22 = arith.constant 0 : index
    %25 = vector.load %arg10[%c0_21, %c0_22] : memref<1x128xf32, #tpu.memory_space<vmem>>, vector<1x128xf32>
    tpu.vector_store %arg10[%c0_21, %c0_22], %24 {strides = array<i32>} : memref<1x128xf32, #tpu.memory_space<vmem>>, vector<1x128xf32>,
    return
  }
  func.func @transform_0(%arg0: i32) -> (i32, i32) {
    %c0_i32 = arith.constant 0 : i32
    %c0_i32_0 = arith.constant 0 : i32
    return %arg0, %c0_i32 : i32, i32
  }
  func.func @transform_1(%arg0: i32) -> (i32, i32) {
    %c0_i32 = arith.constant 0 : i32
    %c0_i32_0 = arith.constant 0 : i32
    return %arg0, %c0_i32 : i32, i32
  }
  func.func @transform_2(%arg0: i32) -> (i32, i32) {
    %c0_i32 = arith.constant 0 : i32
    %c0_i32_0 = arith.constant 0 : i32
    %c0_i32_1 = arith.constant 0 : i32
    return %c0_i32, %c0_i32_0 : i32, i32
  }
  func.func @transform_3(%arg0: i32) -> (i32, i32) {
    %c0_i32 = arith.constant 0 : i32
    %c0_i32_0 = arith.constant 0 : i32
    %c0_i32_1 = arith.constant 0 : i32
    return %c0_i32, %c0_i32_0 : i32, i32
  }
  func.func @transform_4(%arg0: i32) -> (i32, i32) {
    %c0_i32 = arith.constant 0 : i32
    %c0_i32_0 = arith.constant 0 : i32
    %c0_i32_1 = arith.constant 0 : i32
    return %c0_i32, %c0_i32_0 : i32, i32
  }
  func.func @transform_5(%arg0: i32) -> (i32, i32) {
    %c0_i32 = arith.constant 0 : i32
    %c0_i32_0 = arith.constant 0 : i32
    %c0_i32_1 = arith.constant 0 : i32
    return %c0_i32, %c0_i32_0 : i32, i32
  }
  func.func @transform_6(%arg0: i32) -> (i32, i32) {
    %c0_i32 = arith.constant 0 : i32
    %c0_i32_0 = arith.constant 0 : i32
    %c0_i32_1 = arith.constant 0 : i32
    return %c0_i32, %c0_i32_0 : i32, i32
  }
  func.func @transform_7(%arg0: i32) -> (i32, i32) {
    %c0_i32 = arith.constant 0 : i32
    %c0_i32_0 = arith.constant 0 : i32
    %c0_i32_1 = arith.constant 0 : i32
    return %c0_i32, %c0_i32_0 : i32, i32
  }
  func.func @transform_8(%arg0: i32) -> i32 {
    %c0_i32 = arith.constant 0 : i32
    %c0_i32_0 = arith.constant 0 : i32
    return %c0_i32 : i32
  }
  func.func @transform_9(%arg0: i32) -> (i32, i32) {
    %c0_i32 = arith.constant 0 : i32
    %c0_i32_0 = arith.constant 0 : i32
    return %c0_i32, %arg0 : i32, i32
  }
}

</mosaic_0001>

<bundles_post_ra>
// kernel: distance_mlp_forward.1
= control target key start
LH: loop header
LB: loop body
LE: loop exit
PB: predicated region body
PF: predicated region fallthrough
CT: control target
= control target key end

     0   :  { %s1970_s0 = inlined_call_operand.vmem [shape: f32[200,16], index: 0, kind: input, shape index: {}]   ;;  %s1971_s1 = inlined_call_operand.vmem [shape: f32[200,16], index: 1, kind: input, shape index: {}]   ;;  %s1972_s2 = inlined_call_operand.vmem [shape: f32[16,128], index: 2, kind: input, shape index: {}]   ;;  %s1973_s3 = inlined_call_operand.vmem [shape: f32[16,128], index: 3, kind: input, shape index: {}]   ;;  %s1974_s4 = inlined_call_operand.vmem [shape: f32[1,128], index: 4, kind: input, shape index: {}]   ;;  %s1975_s5 = inlined_call_operand.vmem [shape: f32[128,128], index: 5, kind: input, shape index: {}]   ;;  %s1976_s6 = inlined_call_operand.vmem [shape: f32[1,128], index: 6, kind: input, shape index: {}]   ;;  %s1977_s7 = inlined_call_operand.vmem [shape: f32[8,128], index: 7, kind: input, shape index: {}]   ;;  %s1978_s8 = inlined_call_operand.<no memory space> [shape: f32[1], index: 8, kind: input, shape index: {}]   ;;  %s1979_s9 = inlined_call_operand.hbm [shape: f32[1,256], index: 9, kind: output, shape index: {}]  }
   0x1   :  { %14 = sst [smem:[#allocation2]] %s1978_s8 }
   0x2   :  { %15 = vsyncpa [#allocation4], 0 }
   0x3   :  { %17 = vsyncpa [#allocation4 + $0x1], 0  ;;  %s1716_s11 = smov 0   ;;  %s1718_s12 = smov 0  }
   0x4   :  { %s1720_s13 = smov 0   ;;  %s1722_s14 = smov 0  }
   0x5 LB: > { %s1195_s8 = sadd.s32 4294967295, %s1657_s14   ;;  %s1196_s15 = sadd.s32 4294967294, %s1657_s14   ;;  %s1657_s14 = sphi %s1722_s14, %s1985_s14   ;;  %s1653_s13 = sphi %s1720_s13, %s1984_s13   ;;  %s1649_s12 = sphi %s1718_s12, %s1983_s12   ;;  %s1645_s11 = sphi %s1716_s11, %s1982_s11  }
   0x6   : > { %s1739_s16 = sadd.s32 1, %s1657_s14   ;;  %s229_s17 = sadd.s32 1, %s1653_s13 }
   0x7   : > { %s226_s18 = ssub.s32 %s1657_s14, %s1739_s16  ;;  %p239_p0 = scmp.ne.s32.totalorder %s1653_s13, %s1649_s12 }
   0x8   : > { %p227_p1 = scmp.eq.s32.totalorder %s226_s18, 0  ;;  %p240_p2 = scmp.eq.s32.totalorder %s1195_s8, 1 }
   0x9   : > { %p245_p3 = scmp.ne.s32.totalorder %s1649_s12, %s1645_s11  ;;  %p246_p4 = scmp.eq.s32.totalorder %s1196_s15, 1 }
   0xa   : > { %s1749_s19 = scalar_select %p227_p1, %s1653_s13, %s229_s17  }
   0xb   : > { %p1751_p5 = por %p240_p2, %p239_p0  ;;  %p1755_p6 = por %p246_p4, %p245_p3 }
   0xc   : > { %p1199_p7 = scmp.ge.s32.totalorder %s1657_s14, 1  ;;  %p319_p8 = scmp.lt.s32.totalorder %s1657_s14, 3 }
   0xe   : > { %p320_p9 = pnand %p1199_p7, %p319_p8 }
   0xf   : > { %v429_v0 = vld [vmem:[%s1973_s3] sm:$0xff] (!%p320_p9)  ;;  %v430_v1 = vld [vmem:[%s1973_s3 + $0x8] sm:$0xff] (!%p320_p9)  ;;  %s1767_s26 = sshll.u32 (!%p320_p9), %s1195_s8, 4  ;;  %v859_v9 = vld [vmem:[%s1975_s5 + $0x10] sm:$0xff] (!%p320_p9)  ;;  %vm431_vm0 = vcmask (!%p320_p9), 130048   ;;  %vm1660_vm1 = vmmov (!%p320_p9), 0  }
  0x10   : > { %323 = sbr.rel (%p320_p9) target bundleno = 789 (0x315), region = 56  ;;  %v411_v2 = vld [vmem:[%s1972_s2] sm:$0xff] (!%p320_p9)  ;;  %v1473_v3 = vpack.c.bf16 (!%p320_p9), %v430_v1, %v429_v0  ;;  %p372_p10 = scmp.lt.s32.totalorder (!%p320_p9), %s1767_s26, 24  ;;  %v412_v4 = vld [vmem:[%s1972_s2 + $0x8] sm:$0xff] (!%p320_p9)  ;;  %v860_v10 = vld [vmem:[%s1975_s5 + $0x18] sm:$0xff] (!%p320_p9) }
  0x11   : > { %v857_v5 = vld [vmem:[%s1975_s5] sm:$0xff] (!%p320_p9)  ;;  %v858_v6 = vld [vmem:[%s1975_s5 + $0x8] sm:$0xff] (!%p320_p9)  ;;  %v1477_v7 = vpack.c.bf16 (!%p320_p9), %v412_v4, %v411_v2  ;;  %v1485_v11 = vpack.c.bf16 (!%p320_p9), %v860_v10, %v859_v9  ;;  %v863_v14 = vld [vmem:[%s1975_s5 + $0x30] sm:$0xff] (!%p320_p9)  ;;  %s1112_s29 = sld [smem:[#allocation2]] (!%p320_p9)  ;;  %s365_s30 = sand.u32 (!%p320_p9), 1, %s1649_s12  }
  0x12   : > { %v1481_v8 = vpack.c.bf16 (!%p320_p9), %v858_v6, %v857_v5  ;;  %1474 = vmatprep.subr.bf16.mxu0 (!%p320_p9), %v1473_v3  ;;  %v861_v12 = vld [vmem:[%s1975_s5 + $0x20] sm:$0xff] (!%p320_p9)  ;;  %v862_v13 = vld [vmem:[%s1975_s5 + $0x28] sm:$0xff] (!%p320_p9)  ;;  %v864_v15 = vld [vmem:[%s1975_s5 + $0x38] sm:$0xff] (!%p320_p9)  ;;  %s1928_s17 = scalar_lea.hbm (!%p320_p9), %s1979_s9, %s1767_s26  ;;  %s1117_s8 = scalar_lea.sflag (!%p320_p9), [#allocation4], %s365_s30 }
  0x13   : > { %1476 = vmatpush3.bf16.msra.mxu0 (!%p320_p9), %v1473_v3  ;;  %v1489_v19 = vpack.c.bf16 (!%p320_p9), %v862_v13, %v861_v12  ;;  %v1493_v21 = vpack.c.bf16 (!%p320_p9), %v864_v15, %v863_v14  ;;  %v865_v23 = vld [vmem:[%s1975_s5 + $0x40] sm:$0xff] (!%p320_p9)  ;;  %v866_v24 = vld [vmem:[%s1975_s5 + $0x48] sm:$0xff] (!%p320_p9)  ;;  %v867_v28 = vld [vmem:[%s1975_s5 + $0x50] sm:$0xff] (!%p320_p9)  ;;  %s1662_s23 = smov (!%p320_p9), [#allocation3]  }
  0x14   : > { %1482 = vmatprep.subr.bf16.mxu1 (!%p320_p9), %v1481_v8  ;;  %1478 = vmatprep.subr.bf16.mxu0 (!%p320_p9), %v1477_v7  ;;  %v1497_v26 = vpack.c.bf16 (!%p320_p9), %v866_v24, %v865_v23  ;;  %v868_v29 = vld [vmem:[%s1975_s5 + $0x58] sm:$0xff] (!%p320_p9)  ;;  %v869_v33 = vld [vmem:[%s1975_s5 + $0x60] sm:$0xff] (!%p320_p9)  ;;  %v870_v34 = vld [vmem:[%s1975_s5 + $0x68] sm:$0xff] (!%p320_p9)  ;;  %s1599_s24 = sshll.u32 (!%p320_p9), %s1662_s23, 4  ;;  %s1600_s24 = int_to_ptr.vmem [resolvable:$false] %s1599_s24 }
  0x15   : > { %1484 = vmatpush3.bf16.msra.mxu1 (!%p320_p9), %v1481_v8  ;;  %v1501_v31 = vpack.c.bf16 (!%p320_p9), %v868_v29, %v867_v28  ;;  %v1505_v36 = vpack.c.bf16 (!%p320_p9), %v870_v34, %v869_v33  ;;  %v871_v59 = vld [vmem:[%s1975_s5 + $0x70] sm:$0xff] (!%p320_p9)  ;;  %v872_v60 = vld [vmem:[%s1975_s5 + $0x78] sm:$0xff] (!%p320_p9)  ;;  %v1236_v62 = vld [vmem:[%s1974_s4] ss:$0 sm:$0xff] (!%p320_p9)  ;;  %s1601_s27 = scalar_lea.vmem (!%p320_p9), %s1600_s24, 32 }
  0x16   : > { %1486 = vmatprep.subr.bf16.mxu1 (!%p320_p9), %v1485_v11  ;;  %v1509_v61 = vpack.c.bf16 (!%p320_p9), %v872_v60, %v871_v59 }
  0x17   : > { %s1789_s25 = scalar_select %p372_p10, %s1767_s26, 24 }
  0x19   : > { %s1201_s10 = sshll.u32 %s1789_s25, 3  ;;  %1488 = vmatpush3.bf16.msra.mxu1 %v1485_v11 }
  0x1a   : > { %s1803_s18 = scalar_lea.vmem %s1971_s1, %s1201_s10  ;;  %1490 = vmatprep.subr.bf16.mxu1 %v1489_v19  ;;  %s1862_s15 = scalar_lea.vmem %s1970_s0, %s1201_s10 }
  0x1b   : > { %v413_v16 = vld [vmem:[%s1803_s18] sm:$0xff]  ;;  %v414_v17 = vld [vmem:[%s1803_s18 + $0x8] sm:$0xff]  ;;  %v415_v18 = vld [vmem:[%s1803_s18 + $0x10] sm:$0xff] }
  0x1c   : > { %1330 = vmatprep.mubr.msk.f32.mxu0 %vm431_vm0, %v413_v16  ;;  %v416_v20 = vld [vmem:[%s1803_s18 + $0x18] sm:$0xff]  ;;  %v417_v22 = vld [vmem:[%s1803_s18 + $0x20] sm:$0xff]  ;;  %v418_v25 = vld [vmem:[%s1803_s18 + $0x28] sm:$0xff] }
  0x1d   : > { %1331 = vmatmul.mubr.msk.f32.vlgmr.msra.gmra.mrb[0].mxu0 %vm431_vm0, %v414_v17  ;;  %1492 = vmatpush3.bf16.msra.mxu1 %v1489_v19  ;;  %v419_v27 = vld [vmem:[%s1803_s18 + $0x30] sm:$0xff]  ;;  %v420_v30 = vld [vmem:[%s1803_s18 + $0x38] sm:$0xff]  ;;  %v421_v32 = vld [vmem:[%s1803_s18 + $0x40] sm:$0xff] }
  0x1e   : > { %1480 = vmatpush3.bf16.msra.mxu0 %v1477_v7  ;;  %1333 = vmatprep.mubr.msk.f32.mxu0 %vm431_vm0, %v415_v18  ;;  %v422_v35 = vld [vmem:[%s1803_s18 + $0x48] sm:$0xff]  ;;  %v423_v37 = vld [vmem:[%s1803_s18 + $0x50] sm:$0xff]  ;;  %v424_v38 = vld [vmem:[%s1803_s18 + $0x58] sm:$0xff] }
  0x1f   : > { %1494 = vmatprep.subr.bf16.mxu1 %v1493_v21  ;;  %v425_v39 = vld [vmem:[%s1803_s18 + $0x60] sm:$0xff]  ;;  %v426_v40 = vld [vmem:[%s1803_s18 + $0x68] sm:$0xff]  ;;  %v427_v41 = vld [vmem:[%s1803_s18 + $0x70] sm:$0xff] }
  0x20   : > { %v428_v42 = vld [vmem:[%s1803_s18 + $0x78] sm:$0xff]  ;;  %v395_v43 = vld [vmem:[%s1862_s15] sm:$0xff]  ;;  %v396_v44 = vld [vmem:[%s1862_s15 + $0x8] sm:$0xff] }
  0x21   : > { %1334 = vmatmul.mubr.msk.f32.gmra.mrb[2].mxu0 %vm431_vm0, %v416_v20  ;;  %1496 = vmatpush3.bf16.msra.mxu1 %v1493_v21  ;;  %v397_v45 = vld [vmem:[%s1862_s15 + $0x10] sm:$0xff]  ;;  %v398_v46 = vld [vmem:[%s1862_s15 + $0x18] sm:$0xff]  ;;  %v399_v47 = vld [vmem:[%s1862_s15 + $0x20] sm:$0xff] }
  0x22   : > { %1336 = vmatprep.mubr.msk.f32.mxu0 %vm431_vm0, %v417_v22  ;;  %1498 = vmatprep.subr.bf16.mxu1 %v1497_v26  ;;  %v400_v48 = vld [vmem:[%s1862_s15 + $0x28] sm:$0xff]  ;;  %v401_v49 = vld [vmem:[%s1862_s15 + $0x30] sm:$0xff]  ;;  %v402_v50 = vld [vmem:[%s1862_s15 + $0x38] sm:$0xff] }
  0x23   : > { %v403_v51 = vld [vmem:[%s1862_s15 + $0x40] sm:$0xff]  ;;  %v404_v52 = vld [vmem:[%s1862_s15 + $0x48] sm:$0xff]  ;;  %v405_v53 = vld [vmem:[%s1862_s15 + $0x50] sm:$0xff] }
  0x24   : > { %v406_v54 = vld [vmem:[%s1862_s15 + $0x58] sm:$0xff]  ;;  %v407_v55 = vld [vmem:[%s1862_s15 + $0x60] sm:$0xff]  ;;  %v408_v56 = vld [vmem:[%s1862_s15 + $0x68] sm:$0xff] }
  0x25   : > { %1337 = vmatmul.mubr.msk.f32.gmra.mrb[4].mxu0 %vm431_vm0, %v418_v25  ;;  %1500 = vmatpush3.bf16.msra.mxu1 %v1497_v26  ;;  %v409_v57 = vld [vmem:[%s1862_s15 + $0x70] sm:$0xff]  ;;  %v410_v58 = vld [vmem:[%s1862_s15 + $0x78] sm:$0xff]  ;;  %s366_s15 = scalar_lea.vmem [#allocation3], %s365_s30 }
  0x26   : > { %1339 = vmatprep.mubr.msk.f32.mxu0 %vm431_vm0, %v419_v27  ;;  %1502 = vmatprep.subr.bf16.mxu1 %v1501_v31  ;;  %s1129_s25 = sshll.u32 %s366_s15, 4  ;;  %s1930_s25 = int_to_ptr.vmem [resolvable:$true] %s1129_s25 }
  0x27   : > { %s1595_s22 = scalar_lea.vmem %s1930_s25, 16  ;;  %p1602_p0 = scmp.lt.s32.totalorder %s1930_s25, %s1600_s24 }
  0x28   : > { %p1596_p11 = scmp.ne.s32.totalorder %s1930_s25, %s1595_s22  ;;  %p1603_p1 = scmp.lt.s32.totalorder %s1601_s27, %s1595_s22 }
  0x29   : > { %1340 = vmatmul.mubr.msk.f32.gmra.mrb[6].mxu0 %vm431_vm0, %v420_v30  ;;  %1504 = vmatpush3.bf16.msra.mxu1 %v1501_v31 }
  0x2a   : > { %1342 = vmatprep.mubr.msk.f32.mxu0 %vm431_vm0, %v421_v32  ;;  %1506 = vmatprep.subr.bf16.mxu1 %v1505_v36  ;;  %p1597_p12 = pnand %p1596_p11, %p1751_p5  ;;  %p1604_p2 = por %p1603_p1, %p1602_p0 }
  0x2c   : > { %p1598_p13 = pneg %p1597_p12 }
  0x2d   : > { %1343 = vmatmul.mubr.msk.f32.gmra.mrb[8].mxu0 %vm431_vm0, %v422_v35  ;;  %1508 = vmatpush3.bf16.msra.mxu1 %v1505_v36 }
  0x2e   : > { %1345 = vmatprep.mubr.msk.f32.mxu0 %vm431_vm0, %v423_v37  ;;  %1510 = vmatprep.subr.bf16.mxu1 %v1509_v61  ;;  %p1605_p3 = pnand %p1604_p2, %p1598_p13 }
  0x31   : > { %1346 = vmatmul.mubr.msk.f32.gmra.mrb[10].mxu0 %vm431_vm0, %v424_v38  ;;  %1512 = vmatpush3.bf16.msra.mxu1 %v1509_v61 }
  0x32   : > { %1348 = vmatprep.mubr.msk.f32.mxu0 %vm431_vm0, %v425_v39 }
  0x35   : > { %1349 = vmatmul.mubr.msk.f32.gmra.mrb[12].mxu0 %vm431_vm0, %v426_v40 }
  0x36   : > { %1351 = vmatprep.mubr.msk.f32.mxu0 %vm431_vm0, %v427_v41 }
  0x39   : > { %1352 = vmatmul.mubr.msk.f32.gmra.mrb[14].mxu0 %vm431_vm0, %v428_v42 }
  0x3a   : > { %1358 = vmatprep.mubr.msk.f32.mxu0 %vm431_vm0, %v395_v43 }
  0x3d   : > { %1359 = vmatmul.mubr.msk.f32.vlgmr.msra.gmra.mrb[0].mxu0 %vm431_vm0, %v396_v44 }
  0x3e   : > { %1361 = vmatprep.mubr.msk.f32.mxu0 %vm431_vm0, %v397_v45 }
  0x41   : > { %1362 = vmatmul.mubr.msk.f32.gmra.mrb[2].mxu0 %vm431_vm0, %v398_v46 }
  0x42   : > { %1364 = vmatprep.mubr.msk.f32.mxu0 %vm431_vm0, %v399_v47  ;;  %v1659_v47 = vmov 0.0|0.0  }
  0x43   : > { %1513 = vmatprep.subr.bf16.mxu1 %v1659_v47 }
  0x45   : > { %1365 = vmatmul.mubr.msk.f32.gmra.mrb[4].mxu0 %vm431_vm0, %v400_v48  ;;  %v1661_v48 = vmov 0.0  }
  0x46   : > { %1367 = vmatprep.mubr.msk.f32.mxu0 %vm431_vm0, %v401_v49  ;;  %v1237_v49 = vld [vmem:[%s1976_s6] ss:$0 sm:$0xff] }
  0x49   : > { %1368 = vmatmul.mubr.msk.f32.gmra.mrb[6].mxu0 %vm431_vm0, %v402_v50 }
  0x4a   : > { %1370 = vmatprep.mubr.msk.f32.mxu0 %vm431_vm0, %v403_v51 }
  0x4d   : > { %1371 = vmatmul.mubr.msk.f32.gmra.mrb[8].mxu0 %vm431_vm0, %v404_v52 }
  0x4e   : > { %1373 = vmatprep.mubr.msk.f32.mxu0 %vm431_vm0, %v405_v53 }
  0x51   : > { %1374 = vmatmul.mubr.msk.f32.gmra.mrb[10].mxu0 %vm431_vm0, %v406_v54 }
  0x52   : > { %1376 = vmatprep.mubr.msk.f32.mxu0 %vm431_vm0, %v407_v55 }
  0x55   : > { %1377 = vmatmul.mubr.msk.f32.gmra.mrb[12].mxu0 %vm431_vm0, %v408_v56 }
  0x56   : > { %1379 = vmatprep.mubr.msk.f32.mxu0 %vm431_vm0, %v409_v57 }
  0x59   : > { %1380 = vmatmul.mubr.msk.f32.gmra.mrb[14].mxu0 %vm431_vm0, %v410_v58 }
 0x110   : > { %v1360_v63 = vpop.f32.mrb[0].mxu0 }
 0x111   : > { %v826_v0 = vadd.f32 %v1360_v63, %v1236_v62  ;;  %v739_v1 = vpop.f32.mrb[1].mxu0 }
 0x112   : > { %v825_v2 = vadd.f32 %v1236_v62, %v739_v1 }
 0x113   : > { %v842_v5 = vmax.f32 %v826_v0, 0.0 }
 0x114   : > { %v1363_v3 = vpop.f32.mrb[2].mxu0  ;;  %v841_v4 = vmax.f32 %v825_v2, 0.0 }
 0x115   : > { %v828_v6 = vadd.f32 %v1363_v3, %v1236_v62  ;;  %v749_v7 = vpop.f32.mrb[3].mxu0 }
 0x116   : > { %v827_v8 = vadd.f32 %v1236_v62, %v749_v7  ;;  %1414 = vmatprep.mubr.f32.mxu1 %v841_v4 }
 0x117   : > { %1415 = vmatmul.mubr.f32.vlgmr.msra.gmra.mrb[0].mxu1 %v842_v5  ;;  %v844_v11 = vmax.f32 %v828_v6, 0.0 }
 0x118   : > { %v843_v9 = vmax.f32 %v827_v8, 0.0  ;;  %v1366_v10 = vpop.f32.mrb[4].mxu0 }
 0x119   : > { %v830_v12 = vadd.f32 %v1366_v10, %v1236_v62  ;;  %v759_v13 = vpop.f32.mrb[5].mxu0 }
 0x11a   : > { %v829_v14 = vadd.f32 %v1236_v62, %v759_v13  ;;  %1417 = vmatprep.mubr.f32.mxu1 %v843_v9 }
 0x11b   : > { %1418 = vmatmul.mubr.f32.gmra.mrb[2].mxu1 %v844_v11  ;;  %v846_v17 = vmax.f32 %v830_v12, 0.0 }
 0x11c   : > { %v845_v15 = vmax.f32 %v829_v14, 0.0  ;;  %v1369_v16 = vpop.f32.mrb[6].mxu0 }
 0x11d   : > { %v832_v18 = vadd.f32 %v1369_v16, %v1236_v62  ;;  %v769_v19 = vpop.f32.mrb[7].mxu0 }
 0x11e   : > { %v831_v20 = vadd.f32 %v1236_v62, %v769_v19  ;;  %1420 = vmatprep.mubr.f32.mxu1 %v845_v15 }
 0x11f   : > { %1421 = vmatmul.mubr.f32.gmra.mrb[4].mxu1 %v846_v17  ;;  %v848_v23 = vmax.f32 %v832_v18, 0.0 }
 0x120   : > { %v847_v21 = vmax.f32 %v831_v20, 0.0  ;;  %v1372_v22 = vpop.f32.mrb[8].mxu0 }
 0x121   : > { %v834_v24 = vadd.f32 %v1372_v22, %v1236_v62  ;;  %v779_v25 = vpop.f32.mrb[9].mxu0 }
 0x122   : > { %v833_v26 = vadd.f32 %v1236_v62, %v779_v25  ;;  %1423 = vmatprep.mubr.f32.mxu1 %v847_v21 }
 0x123   : > { %1424 = vmatmul.mubr.f32.gmra.mrb[6].mxu1 %v848_v23  ;;  %v850_v29 = vmax.f32 %v834_v24, 0.0 }
 0x124   : > { %v849_v27 = vmax.f32 %v833_v26, 0.0  ;;  %v1375_v28 = vpop.f32.mrb[10].mxu0 }
 0x125   : > { %v836_v30 = vadd.f32 %v1375_v28, %v1236_v62  ;;  %v789_v31 = vpop.f32.mrb[11].mxu0 }
 0x126   : > { %v835_v32 = vadd.f32 %v1236_v62, %v789_v31  ;;  %1426 = vmatprep.mubr.f32.mxu1 %v849_v27 }
 0x127   : > { %1427 = vmatmul.mubr.f32.gmra.mrb[8].mxu1 %v850_v29  ;;  %v852_v35 = vmax.f32 %v836_v30, 0.0 }
 0x128   : > { %v851_v33 = vmax.f32 %v835_v32, 0.0  ;;  %v1378_v34 = vpop.f32.mrb[12].mxu0 }
 0x129   : > { %v838_v36 = vadd.f32 %v1378_v34, %v1236_v62  ;;  %v799_v37 = vpop.f32.mrb[13].mxu0 }
 0x12a   : > { %v837_v38 = vadd.f32 %v1236_v62, %v799_v37  ;;  %1429 = vmatprep.mubr.f32.mxu1 %v851_v33 }
 0x12b   : > { %1430 = vmatmul.mubr.f32.gmra.mrb[10].mxu1 %v852_v35  ;;  %v854_v41 = vmax.f32 %v838_v36, 0.0 }
 0x12c   : > { %v853_v39 = vmax.f32 %v837_v38, 0.0  ;;  %v1381_v40 = vpop.f32.mrb[14].mxu0 }
 0x12d   : > { %v840_v42 = vadd.f32 %v1381_v40, %v1236_v62  ;;  %v809_v43 = vpop.f32.mrb[15].mxu0 }
 0x12e   : > { %v839_v44 = vadd.f32 %v1236_v62, %v809_v43  ;;  %1432 = vmatprep.mubr.f32.mxu1 %v853_v39  ;;  %v1113_v43 = vstv %s1112_s29 }
 0x12f   : > { %1433 = vmatmul.mubr.f32.gmra.mrb[12].mxu1 %v854_v41  ;;  %v856_v46 = vmax.f32 %v840_v42, 0.0  ;;  %v1041_v42 = vld [vmem:[%s1977_s7] sm:$0xff] }
 0x130   : > { %v855_v45 = vmax.f32 %v839_v44, 0.0 }
 0x132   : > { %1435 = vmatprep.mubr.f32.mxu1 %v855_v45 }
 0x133   : > { %1436 = vmatmul.mubr.f32.gmra.mrb[14].mxu1 %v856_v46 }
 0x134   : > { %1470 = vmatprep.mubr.msk.f32.mxu1 %vm1660_vm1, %v1661_v48 }
 0x1ea   : > { %v1416_v50 = vpop.f32.mrb[0].mxu1 }
 0x1eb   : > { %v952_v51 = vadd.f32 %v1416_v50, %v1237_v49  ;;  %v946_v52 = vpop.f32.mrb[1].mxu1 }
 0x1ec   : > { %v947_v53 = vadd.f32 %v1237_v49, %v946_v52 }
 0x1ed   : > { %v1026_v54 = vmax.f32 %v952_v51, 0.0 }
 0x1ee   : > { %v1025_v55 = vmax.f32 %v947_v53, 0.0  ;;  %v1419_v56 = vpop.f32.mrb[2].mxu1 }
 0x1ef   : > { %v962_v57 = vadd.f32 %v1419_v56, %v1237_v49  ;;  %v956_v58 = vpop.f32.mrb[3].mxu1 }
 0x1f0   : > { %v1514_v59 = vpack.c.bf16 %v1026_v54, %v1025_v55  ;;  %v957_v60 = vadd.f32 %v1237_v49, %v956_v58 }
 0x1f1   : > { %v1028_v61 = vmax.f32 %v962_v57, 0.0 }
 0x1f2   : > { %v1027_v62 = vmax.f32 %v957_v60, 0.0  ;;  %v1422_v63 = vpop.f32.mrb[4].mxu1  ;;  %1515 = vmatpush3.bf16.xpose.msra.mxu1 %v1514_v59 }
 0x1f3   : > { %v972_v0 = vadd.f32 %v1422_v63, %v1237_v49  ;;  %v966_v1 = vpop.f32.mrb[5].mxu1  ;;  %1516 = vmatprep.subr.bf16.mxu1 %v1659_v47 }
 0x1f4   : > { %v1517_v2 = vpack.c.bf16 %v1028_v61, %v1027_v62  ;;  %v967_v3 = vadd.f32 %v1237_v49, %v966_v1 }
 0x1f5   : > { %v1030_v4 = vmax.f32 %v972_v0, 0.0 }
 0x1f6   : > { %v1029_v5 = vmax.f32 %v967_v3, 0.0  ;;  %v1425_v6 = vpop.f32.mrb[6].mxu1 }
 0x1f7   : > { %v982_v7 = vadd.f32 %v1425_v6, %v1237_v49  ;;  %v976_v8 = vpop.f32.mrb[7].mxu1 }
 0x1f8   : > { %v1520_v9 = vpack.c.bf16 %v1030_v4, %v1029_v5  ;;  %v977_v10 = vadd.f32 %v1237_v49, %v976_v8 }
 0x1f9   : > { %v1032_v11 = vmax.f32 %v982_v7, 0.0 }
 0x1fa   : > { %v1031_v12 = vmax.f32 %v977_v10, 0.0  ;;  %v1428_v13 = vpop.f32.mrb[8].mxu1  ;;  %1518 = vmatpush3.bf16.xpose.msra.mxu1 %v1517_v2 }
 0x1fb   : > { %v992_v14 = vadd.f32 %v1428_v13, %v1237_v49  ;;  %v986_v15 = vpop.f32.mrb[9].mxu1  ;;  %1519 = vmatprep.subr.bf16.mxu1 %v1659_v47 }
 0x1fc   : > { %v1523_v16 = vpack.c.bf16 %v1032_v11, %v1031_v12  ;;  %v987_v17 = vadd.f32 %v1237_v49, %v986_v15 }
 0x1fd   : > { %v1034_v18 = vmax.f32 %v992_v14, 0.0 }
 0x1fe   : > { %v1033_v19 = vmax.f32 %v987_v17, 0.0  ;;  %v1431_v20 = vpop.f32.mrb[10].mxu1 }
 0x1ff   : > { %v1002_v21 = vadd.f32 %v1431_v20, %v1237_v49  ;;  %v996_v22 = vpop.f32.mrb[11].mxu1 }
 0x200   : > { %v1526_v23 = vpack.c.bf16 %v1034_v18, %v1033_v19  ;;  %v997_v24 = vadd.f32 %v1237_v49, %v996_v22 }
 0x201   : > { %v1036_v25 = vmax.f32 %v1002_v21, 0.0 }
 0x202   : > { %v1035_v26 = vmax.f32 %v997_v24, 0.0  ;;  %v1434_v27 = vpop.f32.mrb[12].mxu1  ;;  %1521 = vmatpush3.bf16.xpose.msra.mxu1 %v1520_v9 }
 0x203   : > { %v1012_v28 = vadd.f32 %v1434_v27, %v1237_v49  ;;  %v1006_v29 = vpop.f32.mrb[13].mxu1  ;;  %1522 = vmatprep.subr.bf16.mxu1 %v1659_v47 }
 0x204   : > { %v1529_v30 = vpack.c.bf16 %v1036_v25, %v1035_v26  ;;  %v1007_v31 = vadd.f32 %v1237_v49, %v1006_v29 }
 0x205   : > { %v1038_v32 = vmax.f32 %v1012_v28, 0.0 }
 0x206   : > { %v1037_v33 = vmax.f32 %v1007_v31, 0.0  ;;  %v1437_v34 = vpop.f32.mrb[14].mxu1 }
 0x207   : > { %v1022_v35 = vadd.f32 %v1437_v34, %v1237_v49  ;;  %v1016_v36 = vpop.f32.mrb[15].mxu1 }
 0x208   : > { %v1532_v37 = vpack.c.bf16 %v1038_v32, %v1037_v33  ;;  %v1017_v38 = vadd.f32 %v1237_v49, %v1016_v36 }
 0x209   : > { %v1040_v39 = vmax.f32 %v1022_v35, 0.0 }
 0x20a   : > { %v1039_v40 = vmax.f32 %v1017_v38, 0.0  ;;  %1524 = vmatpush3.bf16.xpose.msra.mxu1 %v1523_v16 }
 0x20b   : > { %1525 = vmatprep.subr.bf16.mxu1 %v1659_v47 }
 0x20c   : > { %v1535_v41 = vpack.c.bf16 %v1040_v39, %v1039_v40 }
 0x212   : > { %1527 = vmatpush3.bf16.xpose.msra.mxu1 %v1526_v23 }
 0x213   : > { %1528 = vmatprep.subr.bf16.mxu1 %v1659_v47 }
 0x21a   : > { %1530 = vmatpush3.bf16.xpose.msra.mxu1 %v1529_v30 }
 0x21b   : > { %1531 = vmatprep.subr.bf16.mxu1 %v1659_v47 }
 0x222   : > { %1533 = vmatpush3.bf16.xpose.msra.mxu1 %v1532_v37 }
 0x223   : > { %1534 = vmatprep.subr.bf16.mxu1 %v1659_v47 }
 0x22a   : > { %1536 = vmatpush3.bf16.xpose.msra.mxu1 %v1535_v41 }
 0x231   : > { %1471 = vmatmul.mubr.f32.vlgmr.msra.gmra.mrb[16].mxu1 %v1041_v42 }
 0x304   : > { %v1108_v44 = vpop.f32.mrb[16].mxu1 }
 0x305   : > { %v1114_v45 = vadd.f32 %v1113_v43, %v1108_v44  ;;  %v1472_v46 = vpop.f32.mrb[17].mxu1 }
 0x307   : > { %1115 = vst [vmem:[%s366_s15] sm:$0x1] %v1114_v45 }
 0x308   : > { %1608 = shalt.err (!%p1605_p3)
}
 0x309   : > { %s1609_s26 = scalar_lea.hbm %s1928_s17, 16  ;;  %s1613_s30 = scalar_lea.hbm %s1979_s9, 32 }
 0x30a   : > { %p1610_p4 = scmp.ne.s32.totalorder %s1928_s17, %s1609_s26  ;;  %p1614_p9 = scmp.lt.u32.totalorder %s1928_s17, %s1979_s9 }
 0x30b   : > { %p1615_p10 = scmp.lt.u32.totalorder %s1613_s30, %s1609_s26  ;;  %p1617_p12 = scmp.lt.u32.totalorder %s1609_s26, %s1928_s17 }
 0x30c   : > { %p1611_p7 = pnand %p1610_p4, %p1751_p5 }
 0x30d   : > { %p1616_p11 = por %p1615_p10, %p1614_p9 }
 0x30e   : > { %p1612_p8 = pneg %p1611_p7 }
 0x30f   : > { %p1618_p13 = por %p1617_p12, %p1616_p11 }
 0x311   : > { %p1619_p0 = pnand %p1618_p13, %p1612_p8 }
 0x313   : > { %1622 = shalt.err (!%p1619_p0)
}
 0x314   : > { %1553 = dma.vmem_to_hbm [thread:$0]  (%p1751_p5), %s1930_s25, 16, %s1928_s17, %s1117_s8  }
 0x315 PF: > { %p1559_p1 = scmp.ge.s32.totalorder %s1657_s14, 2  ;;  %s1141_s18 = sand.u32 1, %s1645_s11  }
 0x316   : > { %s1142_s22 = scalar_lea.sflag [#allocation4], %s1141_s18 }
 0x317   : > { %p1556_p2 = pnand %p1559_p1, %p1755_p6 }
 0x319   : > { %1640 = dma.done.wait (!%p1556_p2), %s1142_s22, 16  }
 0x31a   : > { %1642 = vsyncadd (!%p1556_p2), %s1142_s22, 4294967280  ;;  %p20_p3 = scmp.ge.s32.totalorder %s1739_s16, 4   ;;  %s1982_s11 = smov %s1649_s12 }
 0x31b   : > { %s1983_s12 = smov %s1653_s13  ;;  %s1984_s13 = smov %s1749_s19 }
 0x31c   : > { %s1985_s14 = smov %s1739_s16  ;;  %22 = sbr.rel (!%p20_p3) target bundleno = 5 (0x5), region = 94 }
 0x323   :  { %1146 = vsyncpa [#allocation4], 1 }
 0x324   :  { %1148 = vsyncpa [#allocation4 + $0x1], 1 }

</bundles_post_ra>
